<compile_context>
chip_gen: v5e
topology: v5e:2x2
jax: 0.10.0
libtpu: 0.0.40
codegen_flags: <defaults>
</compile_context>

<pallas_src>
import jax
import jax.numpy as jnp
from jax.experimental import pallas as pl
from jax.experimental.pallas import tpu as pltpu


def _softmax_kernel(x_ref, o_ref):
    # x_ref / o_ref: one (TM, C) row tile; rows are independent.
    x = x_ref[...].astype(jnp.float32)
    row_max = jnp.max(x, axis=1, keepdims=True)          # per-row stabilizer
    e = jnp.exp(x - row_max)
    denom = jnp.sum(e, axis=1, keepdims=True)            # (TM, 1), >= 1
    # EUP vrcp (approx) + one Newton-Raphson step -> ~f32-exact 1/denom.
    inv = pl.reciprocal(denom, approx=True)
    inv = inv * (2.0 - denom * inv)
    o_ref[...] = (e * inv).astype(o_ref.dtype)


def _choose_block_rows(n: int, c: int, itemsize: int) -> int:
    """Row-tile size: ~2 MiB per input block, a multiple of 8 sublanes.

    With input + output double-buffered this stays well under the scoped VMEM
    limit on every generation (v5e 16 MiB / v6e 32 MiB / v7x 32-of-64 MiB).
    """
    target_bytes = 2 * 1024 * 1024
    rows = target_bytes // max(1, c * itemsize)
    rows = max(8, (rows // 8) * 8)
    if rows >= n:
        return n  # single block over all rows; block dim == full dim is legal
    return rows


def softmax_forward(x: jax.Array, *, block_rows=None) -> jax.Array:
    """Pallas TPU softmax matching the numpy reference semantics.

    x: (N, C); softmax along axis=1. Returns (N, C) with x's dtype.
    NOTE: for tiny shapes (like the 8x32 smoke test) the pallas_call is pure
    launch overhead; the tiling pays off once N*C is HBM-bandwidth relevant.
    """
    assert x.ndim == 2, "Softmax reference expects a 2-D (batch, classes) input"
    n, c = x.shape
    tm = block_rows if block_rows is not None else _choose_block_rows(
        n, c, jnp.dtype(x.dtype).itemsize)
    if tm < n:
        assert tm % 8 == 0, "row tile must be a multiple of 8 sublanes"
    grid = (pl.cdiv(n, tm),)
    return pl.pallas_call(
        _softmax_kernel,
        out_shape=jax.ShapeDtypeStruct((n, c), x.dtype),
        grid_spec=pltpu.PrefetchScalarGridSpec(
            num_scalar_prefetch=0,
            grid=grid,
            in_specs=[pl.BlockSpec((tm, c), lambda i: (i, 0))],
            out_specs=pl.BlockSpec((tm, c), lambda i: (i, 0)),
        ),
        compiler_params=pltpu.CompilerParams(
            dimension_semantics=("parallel",),
        ),
    )(x)


def _reference_softmax(x):
    # Pure-JAX mirror of the numpy reference (global max stabilizer).
    e_x = jnp.exp(x - jnp.max(x))
    return e_x / jnp.sum(e_x, axis=1, keepdims=True)


if __name__ == "__main__":
    # Small shape consistent with a classifier's logits: batch=8, classes=32.
    x_small = jax.random.normal(jax.random.PRNGKey(0), (8, 32), jnp.float32) * 3.0
    out_small = jax.block_until_ready(softmax_forward(x_small))
    ref_small = _reference_softmax(x_small)
    assert out_small.shape == ref_small.shape and out_small.dtype == ref_small.dtype
    assert jnp.allclose(out_small, ref_small, atol=1e-5, rtol=1e-5), "mismatch (small)"
    assert jnp.allclose(jnp.sum(out_small, axis=1), 1.0, atol=1e-5)

    # Multi-block path: force a small row tile so the grid has several steps
    # (exercises pipelining and the masked partial last block, N=200 % 64 != 0).
    x_big = jax.random.normal(jax.random.PRNGKey(0), (200, 256), jnp.float32) * 3.0
    out_big = jax.block_until_ready(softmax_forward(x_big, block_rows=64))
    ref_big = _reference_softmax(x_big)
    assert jnp.allclose(out_big, ref_big, atol=1e-5, rtol=1e-5), "mismatch (tiled)"
    assert jnp.allclose(jnp.sum(out_big, axis=1), 1.0, atol=1e-5)

    # TODO(synk): backward(y) (softmax - one_hot(y)) is the training gradient,
    # not part of the forward pass; left to the surrounding framework.
    print("KERNEL_OK")
</pallas_src>

<mosaic_0001>
module attributes {stable_mosaic.version = 11 : i64} {
  func.func @_softmax_kernel(%arg0: i32, %arg1: memref<8x32xf32, #tpu.memory_space<vmem>>, %arg2: memref<8x32xf32, #tpu.memory_space<vmem>>) attributes {dimension_semantics = [#tpu.dimension_semantics<parallel>], iteration_bounds = array<i64: 1>, scalar_prefetch = 0 : i64, scratch_operands = 0 : i64, tpu.core_type = #tpu.core_type<tc>, window_params = [{transform_indices = @transform_0, window_bounds = array<i64: 8, 32>}, {transform_indices = @transform_1, window_bounds = array<i64: 8, 32>}]} {
    %c0 = arith.constant 0 : index
    %c0_0 = arith.constant 0 : index
    %0 = vector.load %arg1[%c0, %c0_0] : memref<8x32xf32, #tpu.memory_space<vmem>>, vector<8x32xf32>
    %cst = arith.constant dense<0xFF800000> : vector<8xf32>
    %1 = vector.multi_reduction <maximumf>, %0, %cst [1] : vector<8x32xf32> to vector<8xf32>
    %2 = vector.shape_cast %1 : vector<8xf32> to vector<8x1xf32>
    %3 = vector.broadcast %2 : vector<8x1xf32> to vector<8x32xf32>
    %4 = arith.subf %0, %3 : vector<8x32xf32>
    %5 = math.exp %4 : vector<8x32xf32>
    %cst_1 = arith.constant dense<0.000000e+00> : vector<8xf32>
    %6 = vector.multi_reduction <add>, %5, %cst_1 [1] : vector<8x32xf32> to vector<8xf32>
    %7 = vector.shape_cast %6 : vector<8xf32> to vector<8x1xf32>
    %8 = tpu.reciprocal %7 {approx = true} : vector<8x1xf32> -> vector<8x1xf32>
    %9 = arith.mulf %7, %8 : vector<8x1xf32>
    %cst_2 = arith.constant 2.000000e+00 : f32
    %10 = vector.broadcast %cst_2 : f32 to vector<8x1xf32>
    %11 = arith.subf %10, %9 : vector<8x1xf32>
    %12 = arith.mulf %8, %11 : vector<8x1xf32>
    %13 = vector.broadcast %12 : vector<8x1xf32> to vector<8x32xf32>
    %14 = arith.mulf %5, %13 : vector<8x32xf32>
    %c0_3 = arith.constant 0 : index
    %c0_4 = arith.constant 0 : index
    %15 = vector.load %arg2[%c0_3, %c0_4] : memref<8x32xf32, #tpu.memory_space<vmem>>, vector<8x32xf32>
    tpu.vector_store %arg2[%c0_3, %c0_4], %14 {strides = array<i32>} : memref<8x32xf32, #tpu.memory_space<vmem>>, vector<8x32xf32>,
    return
  }
  func.func @transform_0(%arg0: i32) -> (i32, i32) {
    %c0_i32 = arith.constant 0 : i32
    %c0_i32_0 = arith.constant 0 : i32
    return %arg0, %c0_i32 : i32, i32
  }
  func.func @transform_1(%arg0: i32) -> (i32, i32) {
    %c0_i32 = arith.constant 0 : i32
    %c0_i32_0 = arith.constant 0 : i32
    return %arg0, %c0_i32 : i32, i32
  }
}

</mosaic_0001>

<bundles_post_ra>
// kernel: tpu_custom_call.1
= control target key start
LH: loop header
LB: loop body
LE: loop exit
PB: predicated region body
PF: predicated region fallthrough
CT: control target
= control target key end

     0   :  { %6 = vsyncpa [#allocation3], 0  ;;  %s136_s0 = inlined_call_operand.hbm [shape: f32[8,32], index: 0, kind: input, shape index: {}]   ;;  %s137_s1 = inlined_call_operand.hbm [shape: f32[8,32], index: 1, kind: output, shape index: {}]  }
   0x1   :  { %7 = vsyncpa [#allocation4], 0  ;;  %s13_s8 = sshll.u32 %s136_s0, 4  ;;  %s115_s9 = smov [#allocation2]   ;;  %s14_s8 = int_to_ptr.hbm [resolvable:$true] %s13_s8 }
   0x2   :  { %s15_s10 = sshll.u32 %s115_s9, 4  ;;  %s16_s10 = int_to_ptr.vmem [resolvable:$true] %s15_s10 }
   0x3   :  { %18 = dma.hbm_to_vmem [thread:$0]  %s14_s8, 128, %s16_s10, [#allocation3]  }
   0x4   :  { %111 = dma.done.wait [#allocation3], 128  }
   0x5   :  { %112 = vsyncadd [#allocation3], 4294967168  ;;  %vm24_vm0 = vcmask 261120   ;;  %v23_v0 = vld [vmem:[#allocation2] sm:$0xff]  ;;  %s116_s0 = smov [#allocation5]   ;;  %s47_s14 = sshll.u32 %s137_s1, 4  ;;  %s48_s14 = int_to_ptr.hbm [resolvable:$true] %s47_s14 }
   0x6   :  { %v25_v1 = vsel %vm24_vm0, %v23_v0, -inf  ;;  %s45_s11 = sshll.u32 %s116_s0, 4  ;;  %s46_s11 = int_to_ptr.vmem [resolvable:$true] %s45_s11 }
   0x7   :  { %26 = vmax.xlane.f32.xlu0 %v25_v1 }
  0x7a   :  { %v27_v2 = vpop.xlane.xlu0 %26 }
  0x7b   :  { %v28_v3 = vsub.f32 %v23_v0, %v27_v2 }
  0x7d   :  { %v29_v4 = vmul.f32 1.442695, %v28_v3 }
  0x7f   :  { %59 = vpow2.f32 %v29_v4 }
  0x85   :  { %v60_v5 = vpop.eup %59 }
  0x86   :  { %v31_v6 = vsel %vm24_vm0, %v60_v5, 0.0 }
  0x87   :  { %32 = vadd.xlane.f32.xlu0 %v31_v6 }
  0xfa   :  { %v33_v7 = vpop.xlane.xlu0 %32 }
  0xfb   :  { %61 = vrcp.f32 %v33_v7 }
 0x101   :  { %v62_v8 = vpop.eup %61 }
 0x102   :  { %v35_v9 = vmul.f32 %v62_v8, %v33_v7 }
 0x104   :  { %v36_v10 = vsub.f32 2.0, %v35_v9 }
 0x106   :  { %v37_v11 = vmul.f32 %v62_v8, %v36_v10 }
 0x108   :  { %v38_v12 = vmul.f32 %v60_v5, %v37_v11 }
 0x10a   :  { %39 = vst.msk [vmem:[#allocation5] sm:$0xff] %vm24_vm0, %v38_v12 }
 0x10b   :  { %50 = dma.vmem_to_hbm [thread:$0]  %s46_s11, 128, %s48_s14, [#allocation4]  }
 0x10c   :  { %113 = dma.done.wait [#allocation4], 128  }
 0x10d   :  { %114 = vsyncadd [#allocation4], 4294967168 }
 0x10e   :  { %55 = vsyncpa [#allocation3], 1 }
 0x10f   :  { %56 = vsyncpa [#allocation4], 1 }

</bundles_post_ra>
